<compile_context>
chip_gen: v7x
topology: tpu7x:2x2x1
jax: 0.10.0
libtpu: 0.0.40
codegen_flags: <defaults>
</compile_context>

<pallas_src>
import functools

import jax
import jax.numpy as jnp
from jax.experimental import pallas as pl
from jax.experimental.pallas import tpu as pltpu

EMBEDDING_DIM = 16
VOCAB_SIZE = 32
HIDDEN_SIZE = 32
NUM_LAYERS = 2
N_META = 8
BATCH = 8   # 8-sublane aligned
SEQ = 8

# ---- packed parameter layout (row offsets; all multiples of 8 -> sublane-tile aligned) ----
PACK_ZW = 0                                   # (V, H)   fused emb @ w_ih_0
PACK_WHH = PACK_ZW + VOCAB_SIZE               # (H, H)
PACK_MW1 = PACK_WHH + HIDDEN_SIZE             # (H, H//2)      in cols [0:16]
PACK_MW2 = PACK_MW1 + HIDDEN_SIZE             # (H//2, 2*NM)   in cols [0:16]
PACK_MW3 = PACK_MW2 + HIDDEN_SIZE // 2        # (2*NM, NM)     in cols [0:8]
PACK_VEC = PACK_MW3 + 2 * N_META              # 8 vector rows: b0, mb1, g1, be1, mb2, g2, be2, mb3
PACK_ROWS = PACK_VEC + 8                      # = 136
PACK_COLS = HIDDEN_SIZE                       # = 32


def _layernorm(x, gamma, beta, eps=1e-5):
    mean = jnp.mean(x, axis=-1, keepdims=True)
    var = jnp.mean((x - mean) ** 2, axis=-1, keepdims=True)
    return (x - mean) * jax.lax.rsqrt(var + eps) * gamma + beta


def _leaky_relu(x, slope=0.01):
    return jnp.where(x >= 0, x, slope * x)


def basic_rnn_fused_kernel(tokens_ref, pack_ref, out_ref, *, B, T, V, H, NM):
    """Fused: one-hot embedding (via precomputed emb@w_ih table) + layer-0 tanh RNN + meta MLP."""
    P = pack_ref[...]                                           # (PACK_ROWS, H) f32
    zw = P[PACK_ZW:PACK_ZW + V, :]                              # (V, H)  precomputed emb @ w_ih
    w_hh = P[PACK_WHH:PACK_WHH + H, :]                          # (H, H)
    mw1 = P[PACK_MW1:PACK_MW1 + H, :H // 2]                     # (H, H//2)
    mw2 = P[PACK_MW2:PACK_MW2 + H // 2, :2 * NM]                # (H//2, 2*NM)
    mw3 = P[PACK_MW3:PACK_MW3 + 2 * NM, :NM]                    # (2*NM, NM)
    b0 = P[PACK_VEC + 0:PACK_VEC + 1, :]                        # (1, H) = b_ih + b_hh
    mb1 = P[PACK_VEC + 1:PACK_VEC + 2, :H // 2]
    g1 = P[PACK_VEC + 2:PACK_VEC + 3, :H // 2]
    be1 = P[PACK_VEC + 3:PACK_VEC + 4, :H // 2]
    mb2 = P[PACK_VEC + 4:PACK_VEC + 5, :2 * NM]
    g2 = P[PACK_VEC + 5:PACK_VEC + 6, :2 * NM]
    be2 = P[PACK_VEC + 6:PACK_VEC + 7, :2 * NM]
    mb3 = P[PACK_VEC + 7:PACK_VEC + 8, :NM]

    tokens = tokens_ref[...]                                    # (B, T) int32

    # Hoist the ENTIRE input projection off the serial recurrence chain:
    # build the one-hot t-major as (T*B, V), then ONE (T*B,V)@(V,H) matmul + bias.
    # (Out-of-range ids -> all-zero row -> zero embedding; does not fault.)
    iota_v = jax.lax.broadcasted_iota(jnp.int32, (B, V), 1)
    onehot = jnp.concatenate(
        [(iota_v == tokens[:, t:t + 1]).astype(jnp.float32) for t in range(T)], axis=0)  # (T*B, V)
    z_all = jnp.dot(onehot, zw, preferred_element_type=jnp.float32) + b0                 # (T*B, H)

    # Layer-0 Elman recurrence: only h @ w_hh + add + tanh remain on the serial chain.
    # RNN layers >= 1 are dead code w.r.t. the returned meta output (only rnn_h[0] is consumed).
    # NOTE: for much larger T, switch this unrolled loop to lax.fori_loop over z_all to bound
    # live ranges; at T=8 full unroll gives the scheduler maximum visibility.
    # NOTE: an MXU-resident w_hh (pltpu.matmul_push_rhs / matmul_acc_lhs / matmul_pop) would
    # shave per-step staging on v7x (addressed MRB) but jnp.dot is kept for portable lowering.
    h = jnp.zeros((B, H), jnp.float32)
    for t in range(T):
        z_t = z_all[t * B:(t + 1) * B, :]                       # static, sublane-tile aligned
        h = jnp.tanh(z_t + jnp.dot(h, w_hh, preferred_element_type=jnp.float32))

    # Meta head: Linear -> LayerNorm -> LeakyReLU -> Linear -> LayerNorm -> LeakyReLU -> Linear
    x = jnp.dot(h, mw1, preferred_element_type=jnp.float32) + mb1
    x = _leaky_relu(_layernorm(x, g1, be1))
    x = jnp.dot(x, mw2, preferred_element_type=jnp.float32) + mb2
    x = _leaky_relu(_layernorm(x, g2, be2))
    # (B, N_META) = (8, 8): one masked sub-128-lane store per call; padding would be net-negative.
    out_ref[...] = jnp.dot(x, mw3, preferred_element_type=jnp.float32) + mb3


def _build_pack(p):
    """Pack every kernel parameter into one sublane-aligned (PACK_ROWS, 32) f32 array."""
    H, V, NM = HIDDEN_SIZE, VOCAB_SIZE, N_META
    hp = jax.lax.Precision.HIGHEST
    zw = jnp.dot(p["emb"], p["w_ih_0"], precision=hp)           # (V, H), computed once here
    pack = jnp.zeros((PACK_ROWS, PACK_COLS), jnp.float32)
    pack = pack.at[PACK_ZW:PACK_ZW + V, :].set(zw)
    pack = pack.at[PACK_WHH:PACK_WHH + H, :].set(p["w_hh_0"])
    pack = pack.at[PACK_MW1:PACK_MW1 + H, :H // 2].set(p["mw1"])
    pack = pack.at[PACK_MW2:PACK_MW2 + H // 2, :2 * NM].set(p["mw2"])
    pack = pack.at[PACK_MW3:PACK_MW3 + 2 * NM, :NM].set(p["mw3"])
    vec_rows = [(p["b_0"], H), (p["mb1"], H // 2), (p["g1"], H // 2), (p["be1"], H // 2),
                (p["mb2"], 2 * NM), (p["g2"], 2 * NM), (p["be2"], 2 * NM), (p["mb3"], NM)]
    for r, (vec, width) in enumerate(vec_rows):
        pack = pack.at[PACK_VEC + r, :width].set(vec[0])
    return pack


def init_params(key):
    """Parameters stored in kernel-ready layout; all transposes / fusions / packing done here."""
    ks = list(jax.random.split(key, 32))
    p = {}
    p["emb"] = jax.random.normal(ks.pop(), (VOCAB_SIZE, EMBEDDING_DIM), jnp.float32)
    bound = 1.0 / float(HIDDEN_SIZE) ** 0.5
    for l in range(NUM_LAYERS):
        in_dim = EMBEDDING_DIM if l == 0 else HIDDEN_SIZE
        w_ih = jax.random.uniform(ks.pop(), (HIDDEN_SIZE, in_dim), jnp.float32, -bound, bound)
        w_hh = jax.random.uniform(ks.pop(), (HIDDEN_SIZE, HIDDEN_SIZE), jnp.float32, -bound, bound)
        b_ih = jax.random.uniform(ks.pop(), (HIDDEN_SIZE,), jnp.float32, -bound, bound)
        b_hh = jax.random.uniform(ks.pop(), (HIDDEN_SIZE,), jnp.float32, -bound, bound)
        p[f"w_ih_{l}"] = w_ih.T                     # (in_dim, H)
        p[f"w_hh_{l}"] = w_hh.T                     # (H, H)
        p[f"b_{l}"] = (b_ih + b_hh)[None, :]        # (1, H) pre-summed
    dims = [(HIDDEN_SIZE, HIDDEN_SIZE // 2), (HIDDEN_SIZE // 2, N_META * 2), (N_META * 2, N_META)]
    for i, (din, dout) in enumerate(dims, start=1):
        bd = 1.0 / float(din) ** 0.5
        p[f"mw{i}"] = jax.random.uniform(ks.pop(), (dout, din), jnp.float32, -bd, bd).T  # (din,dout)
        p[f"mb{i}"] = jax.random.uniform(ks.pop(), (dout,), jnp.float32, -bd, bd)[None, :]
    p["g1"] = jnp.ones((1, HIDDEN_SIZE // 2), jnp.float32)
    p["be1"] = jnp.zeros((1, HIDDEN_SIZE // 2), jnp.float32)
    p["g2"] = jnp.ones((1, N_META * 2), jnp.float32)
    p["be2"] = jnp.zeros((1, N_META * 2), jnp.float32)
    p["pack"] = _build_pack(p)                      # single kernel input for all parameters
    return p


@jax.jit
def basic_rnn_forward(params, tokens):
    B, T = tokens.shape
    tokens = tokens.astype(jnp.int32)   # no-op when already int32
    vmem = pl.BlockSpec(memory_space=pltpu.MemorySpace.VMEM)
    return pl.pallas_call(
        functools.partial(basic_rnn_fused_kernel,
                          B=B, T=T, V=VOCAB_SIZE, H=HIDDEN_SIZE, NM=N_META),
        out_shape=jax.ShapeDtypeStruct((B, N_META), jnp.float32),
        in_specs=[vmem, vmem],          # tokens + packed params: only 2 input DMAs
        out_specs=vmem,
    )(tokens, params["pack"])


def reference_forward(params, tokens):
    """Pure-JAX reference mirroring the full PyTorch forward (including the dead layer 1)."""
    hp = jax.lax.Precision.HIGHEST
    B, T = tokens.shape
    layer_in = params["emb"][tokens]          # (B, T, E)
    h_finals = []
    for l in range(NUM_LAYERS):
        w_ih, w_hh, b = params[f"w_ih_{l}"], params[f"w_hh_{l}"], params[f"b_{l}"]
        h = jnp.zeros((B, HIDDEN_SIZE), jnp.float32)
        outs = []
        for t in range(T):
            h = jnp.tanh(jnp.dot(layer_in[:, t, :], w_ih, precision=hp) + b
                         + jnp.dot(h, w_hh, precision=hp))
            outs.append(h)
        layer_in = jnp.stack(outs, axis=1)
        h_finals.append(h)
    hidden = h_finals[0]                      # rnn_h[0].squeeze(0)
    x = jnp.dot(hidden, params["mw1"], precision=hp) + params["mb1"]
    x = _leaky_relu(_layernorm(x, params["g1"], params["be1"]))
    x = jnp.dot(x, params["mw2"], precision=hp) + params["mb2"]
    x = _leaky_relu(_layernorm(x, params["g2"], params["be2"]))
    return jnp.dot(x, params["mw3"], precision=hp) + params["mb3"]


if __name__ == "__main__":
    key = jax.random.PRNGKey(0)
    pkey, tkey = jax.random.split(key)
    params = init_params(pkey)
    tokens = jax.random.randint(tkey, (BATCH, SEQ), 0, VOCAB_SIZE, dtype=jnp.int32)

    out = basic_rnn_forward(params, tokens)
    out = jax.block_until_ready(out)

    ref = reference_forward(params, tokens)
    assert out.shape == (BATCH, N_META), out.shape
    assert jnp.allclose(out, ref, rtol=1e-4, atol=1e-4), (out, ref)
    print("KERNEL_OK")
</pallas_src>

<mosaic_0001>
module attributes {stable_mosaic.version = 11 : i64} {
  func.func @basic_rnn_fused_kernel(%arg0: memref<8x8xi32, #tpu.memory_space<vmem>>, %arg1: memref<136x32xf32, #tpu.memory_space<vmem>>, %arg2: memref<8x8xf32, #tpu.memory_space<vmem>>) attributes {dimension_semantics = [], scalar_prefetch = 0 : i64, scratch_operands = 0 : i64, tpu.core_type = #tpu.core_type<tc>} {
    %c0 = arith.constant 0 : index
    %c0_0 = arith.constant 0 : index
    %0 = vector.load %arg1[%c0, %c0_0] : memref<136x32xf32, #tpu.memory_space<vmem>>, vector<136x32xf32>
    %1 = vector.extract_strided_slice %0 {offsets = [0, 0], sizes = [32, 32], strides = [1, 1]} : vector<136x32xf32> to vector<32x32xf32>
    %2 = vector.extract_strided_slice %0 {offsets = [32, 0], sizes = [32, 32], strides = [1, 1]} : vector<136x32xf32> to vector<32x32xf32>
    %3 = vector.extract_strided_slice %0 {offsets = [64, 0], sizes = [32, 16], strides = [1, 1]} : vector<136x32xf32> to vector<32x16xf32>
    %4 = vector.extract_strided_slice %0 {offsets = [96, 0], sizes = [16, 16], strides = [1, 1]} : vector<136x32xf32> to vector<16x16xf32>
    %5 = vector.extract_strided_slice %0 {offsets = [112, 0], sizes = [16, 8], strides = [1, 1]} : vector<136x32xf32> to vector<16x8xf32>
    %6 = vector.extract_strided_slice %0 {offsets = [128, 0], sizes = [1, 32], strides = [1, 1]} : vector<136x32xf32> to vector<1x32xf32>
    %7 = vector.extract_strided_slice %0 {offsets = [129, 0], sizes = [1, 16], strides = [1, 1]} : vector<136x32xf32> to vector<1x16xf32>
    %8 = vector.extract_strided_slice %0 {offsets = [130, 0], sizes = [1, 16], strides = [1, 1]} : vector<136x32xf32> to vector<1x16xf32>
    %9 = vector.extract_strided_slice %0 {offsets = [131, 0], sizes = [1, 16], strides = [1, 1]} : vector<136x32xf32> to vector<1x16xf32>
    %10 = vector.extract_strided_slice %0 {offsets = [132, 0], sizes = [1, 16], strides = [1, 1]} : vector<136x32xf32> to vector<1x16xf32>
    %11 = vector.extract_strided_slice %0 {offsets = [133, 0], sizes = [1, 16], strides = [1, 1]} : vector<136x32xf32> to vector<1x16xf32>
    %12 = vector.extract_strided_slice %0 {offsets = [134, 0], sizes = [1, 16], strides = [1, 1]} : vector<136x32xf32> to vector<1x16xf32>
    %13 = vector.extract_strided_slice %0 {offsets = [135, 0], sizes = [1, 8], strides = [1, 1]} : vector<136x32xf32> to vector<1x8xf32>
    %c0_1 = arith.constant 0 : index
    %c0_2 = arith.constant 0 : index
    %14 = vector.load %arg0[%c0_1, %c0_2] : memref<8x8xi32, #tpu.memory_space<vmem>>, vector<8x8xi32>
    %15 = tpu.iota {dimensions = array<i32: 1>} : vector<8x32xi32>
    %16 = vector.extract_strided_slice %14 {offsets = [0, 0], sizes = [8, 1], strides = [1, 1]} : vector<8x8xi32> to vector<8x1xi32>
    %17 = vector.broadcast %16 : vector<8x1xi32> to vector<8x32xi32>
    %18 = arith.cmpi eq, %15, %17 : vector<8x32xi32>
    %19 = arith.extui %18 : vector<8x32xi1> to vector<8x32xi32>
    %20 = arith.sitofp %19 : vector<8x32xi32> to vector<8x32xf32>
    %21 = vector.extract_strided_slice %14 {offsets = [0, 1], sizes = [8, 1], strides = [1, 1]} : vector<8x8xi32> to vector<8x1xi32>
    %22 = vector.broadcast %21 : vector<8x1xi32> to vector<8x32xi32>
    %23 = arith.cmpi eq, %15, %22 : vector<8x32xi32>
    %24 = arith.extui %23 : vector<8x32xi1> to vector<8x32xi32>
    %25 = arith.sitofp %24 : vector<8x32xi32> to vector<8x32xf32>
    %26 = vector.extract_strided_slice %14 {offsets = [0, 2], sizes = [8, 1], strides = [1, 1]} : vector<8x8xi32> to vector<8x1xi32>
    %27 = vector.broadcast %26 : vector<8x1xi32> to vector<8x32xi32>
    %28 = arith.cmpi eq, %15, %27 : vector<8x32xi32>
    %29 = arith.extui %28 : vector<8x32xi1> to vector<8x32xi32>
    %30 = arith.sitofp %29 : vector<8x32xi32> to vector<8x32xf32>
    %31 = vector.extract_strided_slice %14 {offsets = [0, 3], sizes = [8, 1], strides = [1, 1]} : vector<8x8xi32> to vector<8x1xi32>
    %32 = vector.broadcast %31 : vector<8x1xi32> to vector<8x32xi32>
    %33 = arith.cmpi eq, %15, %32 : vector<8x32xi32>
    %34 = arith.extui %33 : vector<8x32xi1> to vector<8x32xi32>
    %35 = arith.sitofp %34 : vector<8x32xi32> to vector<8x32xf32>
    %36 = vector.extract_strided_slice %14 {offsets = [0, 4], sizes = [8, 1], strides = [1, 1]} : vector<8x8xi32> to vector<8x1xi32>
    %37 = vector.broadcast %36 : vector<8x1xi32> to vector<8x32xi32>
    %38 = arith.cmpi eq, %15, %37 : vector<8x32xi32>
    %39 = arith.extui %38 : vector<8x32xi1> to vector<8x32xi32>
    %40 = arith.sitofp %39 : vector<8x32xi32> to vector<8x32xf32>
    %41 = vector.extract_strided_slice %14 {offsets = [0, 5], sizes = [8, 1], strides = [1, 1]} : vector<8x8xi32> to vector<8x1xi32>
    %42 = vector.broadcast %41 : vector<8x1xi32> to vector<8x32xi32>
    %43 = arith.cmpi eq, %15, %42 : vector<8x32xi32>
    %44 = arith.extui %43 : vector<8x32xi1> to vector<8x32xi32>
    %45 = arith.sitofp %44 : vector<8x32xi32> to vector<8x32xf32>
    %46 = vector.extract_strided_slice %14 {offsets = [0, 6], sizes = [8, 1], strides = [1, 1]} : vector<8x8xi32> to vector<8x1xi32>
    %47 = vector.broadcast %46 : vector<8x1xi32> to vector<8x32xi32>
    %48 = arith.cmpi eq, %15, %47 : vector<8x32xi32>
    %49 = arith.extui %48 : vector<8x32xi1> to vector<8x32xi32>
    %50 = arith.sitofp %49 : vector<8x32xi32> to vector<8x32xf32>
    %51 = vector.extract_strided_slice %14 {offsets = [0, 7], sizes = [8, 1], strides = [1, 1]} : vector<8x8xi32> to vector<8x1xi32>
    %52 = vector.broadcast %51 : vector<8x1xi32> to vector<8x32xi32>
    %53 = arith.cmpi eq, %15, %52 : vector<8x32xi32>
    %54 = arith.extui %53 : vector<8x32xi1> to vector<8x32xi32>
    %55 = arith.sitofp %54 : vector<8x32xi32> to vector<8x32xf32>
    %56 = tpu.concatenate %20, %25, %30, %35, %40, %45, %50, %55 in 0 : vector<8x32xf32>, vector<8x32xf32>, vector<8x32xf32>, vector<8x32xf32>, vector<8x32xf32>, vector<8x32xf32>, vector<8x32xf32>, vector<8x32xf32> -> vector<64x32xf32>
    %cst = arith.constant dense<0.000000e+00> : vector<64x32xf32>
    %57 = tpu.matmul %56, %1, %cst {dimension_numbers = #tpu.dot_dimension_numbers<[1], [0], [0], [1], [0, 0, 1, 1], [], []>} : vector<64x32xf32>, vector<32x32xf32>, vector<64x32xf32> -> vector<64x32xf32>
    %58 = vector.broadcast %6 : vector<1x32xf32> to vector<64x32xf32>
    %59 = arith.addf %57, %58 : vector<64x32xf32>
    %cst_3 = arith.constant 0.000000e+00 : f32
    %60 = vector.broadcast %cst_3 : f32 to vector<8x32xf32>
    %61 = vector.extract_strided_slice %59 {offsets = [0, 0], sizes = [8, 32], strides = [1, 1]} : vector<64x32xf32> to vector<8x32xf32>
    %cst_4 = arith.constant dense<0.000000e+00> : vector<8x32xf32>
    %62 = tpu.matmul %60, %2, %cst_4 {dimension_numbers = #tpu.dot_dimension_numbers<[1], [0], [0], [1], [0, 0, 1, 1], [], []>} : vector<8x32xf32>, vector<32x32xf32>, vector<8x32xf32> -> vector<8x32xf32>
    %63 = arith.addf %61, %62 : vector<8x32xf32>
    %64 = math.tanh %63 : vector<8x32xf32>
    %65 = vector.extract_strided_slice %59 {offsets = [8, 0], sizes = [8, 32], strides = [1, 1]} : vector<64x32xf32> to vector<8x32xf32>
    %cst_5 = arith.constant dense<0.000000e+00> : vector<8x32xf32>
    %66 = tpu.matmul %64, %2, %cst_5 {dimension_numbers = #tpu.dot_dimension_numbers<[1], [0], [0], [1], [0, 0, 1, 1], [], []>} : vector<8x32xf32>, vector<32x32xf32>, vector<8x32xf32> -> vector<8x32xf32>
    %67 = arith.addf %65, %66 : vector<8x32xf32>
    %68 = math.tanh %67 : vector<8x32xf32>
    %69 = vector.extract_strided_slice %59 {offsets = [16, 0], sizes = [8, 32], strides = [1, 1]} : vector<64x32xf32> to vector<8x32xf32>
    %cst_6 = arith.constant dense<0.000000e+00> : vector<8x32xf32>
    %70 = tpu.matmul %68, %2, %cst_6 {dimension_numbers = #tpu.dot_dimension_numbers<[1], [0], [0], [1], [0, 0, 1, 1], [], []>} : vector<8x32xf32>, vector<32x32xf32>, vector<8x32xf32> -> vector<8x32xf32>
    %71 = arith.addf %69, %70 : vector<8x32xf32>
    %72 = math.tanh %71 : vector<8x32xf32>
    %73 = vector.extract_strided_slice %59 {offsets = [24, 0], sizes = [8, 32], strides = [1, 1]} : vector<64x32xf32> to vector<8x32xf32>
    %cst_7 = arith.constant dense<0.000000e+00> : vector<8x32xf32>
    %74 = tpu.matmul %72, %2, %cst_7 {dimension_numbers = #tpu.dot_dimension_numbers<[1], [0], [0], [1], [0, 0, 1, 1], [], []>} : vector<8x32xf32>, vector<32x32xf32>, vector<8x32xf32> -> vector<8x32xf32>
    %75 = arith.addf %73, %74 : vector<8x32xf32>
    %76 = math.tanh %75 : vector<8x32xf32>
    %77 = vector.extract_strided_slice %59 {offsets = [32, 0], sizes = [8, 32], strides = [1, 1]} : vector<64x32xf32> to vector<8x32xf32>
    %cst_8 = arith.constant dense<0.000000e+00> : vector<8x32xf32>
    %78 = tpu.matmul %76, %2, %cst_8 {dimension_numbers = #tpu.dot_dimension_numbers<[1], [0], [0], [1], [0, 0, 1, 1], [], []>} : vector<8x32xf32>, vector<32x32xf32>, vector<8x32xf32> -> vector<8x32xf32>
    %79 = arith.addf %77, %78 : vector<8x32xf32>
    %80 = math.tanh %79 : vector<8x32xf32>
    %81 = vector.extract_strided_slice %59 {offsets = [40, 0], sizes = [8, 32], strides = [1, 1]} : vector<64x32xf32> to vector<8x32xf32>
    %cst_9 = arith.constant dense<0.000000e+00> : vector<8x32xf32>
    %82 = tpu.matmul %80, %2, %cst_9 {dimension_numbers = #tpu.dot_dimension_numbers<[1], [0], [0], [1], [0, 0, 1, 1], [], []>} : vector<8x32xf32>, vector<32x32xf32>, vector<8x32xf32> -> vector<8x32xf32>
    %83 = arith.addf %81, %82 : vector<8x32xf32>
    %84 = math.tanh %83 : vector<8x32xf32>
    %85 = vector.extract_strided_slice %59 {offsets = [48, 0], sizes = [8, 32], strides = [1, 1]} : vector<64x32xf32> to vector<8x32xf32>
    %cst_10 = arith.constant dense<0.000000e+00> : vector<8x32xf32>
    %86 = tpu.matmul %84, %2, %cst_10 {dimension_numbers = #tpu.dot_dimension_numbers<[1], [0], [0], [1], [0, 0, 1, 1], [], []>} : vector<8x32xf32>, vector<32x32xf32>, vector<8x32xf32> -> vector<8x32xf32>
    %87 = arith.addf %85, %86 : vector<8x32xf32>
    %88 = math.tanh %87 : vector<8x32xf32>
    %89 = vector.extract_strided_slice %59 {offsets = [56, 0], sizes = [8, 32], strides = [1, 1]} : vector<64x32xf32> to vector<8x32xf32>
    %cst_11 = arith.constant dense<0.000000e+00> : vector<8x32xf32>
    %90 = tpu.matmul %88, %2, %cst_11 {dimension_numbers = #tpu.dot_dimension_numbers<[1], [0], [0], [1], [0, 0, 1, 1], [], []>} : vector<8x32xf32>, vector<32x32xf32>, vector<8x32xf32> -> vector<8x32xf32>
    %91 = arith.addf %89, %90 : vector<8x32xf32>
    %92 = math.tanh %91 : vector<8x32xf32>
    %cst_12 = arith.constant dense<0.000000e+00> : vector<8x16xf32>
    %93 = tpu.matmul %92, %3, %cst_12 {dimension_numbers = #tpu.dot_dimension_numbers<[1], [0], [0], [1], [0, 0, 1, 1], [], []>} : vector<8x32xf32>, vector<32x16xf32>, vector<8x16xf32> -> vector<8x16xf32>
    %94 = vector.broadcast %7 : vector<1x16xf32> to vector<8x16xf32>
    %95 = arith.addf %93, %94 : vector<8x16xf32>
    %cst_13 = arith.constant dense<0.000000e+00> : vector<8xf32>
    %96 = vector.multi_reduction <add>, %95, %cst_13 [1] : vector<8x16xf32> to vector<8xf32>
    %97 = vector.shape_cast %96 : vector<8xf32> to vector<8x1xf32>
    %cst_14 = arith.constant 1.600000e+01 : f32
    %98 = vector.broadcast %cst_14 : f32 to vector<8x1xf32>
    %99 = arith.divf %97, %98 : vector<8x1xf32>
    %100 = vector.broadcast %99 : vector<8x1xf32> to vector<8x16xf32>
    %101 = arith.subf %95, %100 : vector<8x16xf32>
    %102 = arith.mulf %101, %101 : vector<8x16xf32>
    %cst_15 = arith.constant dense<0.000000e+00> : vector<8xf32>
    %103 = vector.multi_reduction <add>, %102, %cst_15 [1] : vector<8x16xf32> to vector<8xf32>
    %104 = vector.shape_cast %103 : vector<8xf32> to vector<8x1xf32>
    %cst_16 = arith.constant 1.600000e+01 : f32
    %105 = vector.broadcast %cst_16 : f32 to vector<8x1xf32>
    %106 = arith.divf %104, %105 : vector<8x1xf32>
    %107 = vector.broadcast %99 : vector<8x1xf32> to vector<8x16xf32>
    %108 = arith.subf %95, %107 : vector<8x16xf32>
    %cst_17 = arith.constant 9.99999974E-6 : f32
    %109 = vector.broadcast %cst_17 : f32 to vector<8x1xf32>
    %110 = arith.addf %106, %109 : vector<8x1xf32>
    %111 = math.rsqrt %110 : vector<8x1xf32>
    %112 = vector.broadcast %111 : vector<8x1xf32> to vector<8x16xf32>
    %113 = arith.mulf %108, %112 : vector<8x16xf32>
    %114 = vector.broadcast %8 : vector<1x16xf32> to vector<8x16xf32>
    %115 = arith.mulf %113, %114 : vector<8x16xf32>
    %116 = vector.broadcast %9 : vector<1x16xf32> to vector<8x16xf32>
    %117 = arith.addf %115, %116 : vector<8x16xf32>
    %cst_18 = arith.constant 0.000000e+00 : f32
    %118 = vector.broadcast %cst_18 : f32 to vector<8x16xf32>
    %119 = arith.cmpf oge, %117, %118 : vector<8x16xf32>
    %cst_19 = arith.constant 0.00999999977 : f32
    %120 = vector.broadcast %cst_19 : f32 to vector<8x16xf32>
    %121 = arith.mulf %120, %117 : vector<8x16xf32>
    %122 = arith.select %119, %117, %121 : vector<8x16xi1>, vector<8x16xf32>
    %cst_20 = arith.constant dense<0.000000e+00> : vector<8x16xf32>
    %123 = tpu.matmul %122, %4, %cst_20 {dimension_numbers = #tpu.dot_dimension_numbers<[1], [0], [0], [1], [0, 0, 1, 1], [], []>} : vector<8x16xf32>, vector<16x16xf32>, vector<8x16xf32> -> vector<8x16xf32>
    %124 = vector.broadcast %10 : vector<1x16xf32> to vector<8x16xf32>
    %125 = arith.addf %123, %124 : vector<8x16xf32>
    %cst_21 = arith.constant dense<0.000000e+00> : vector<8xf32>
    %126 = vector.multi_reduction <add>, %125, %cst_21 [1] : vector<8x16xf32> to vector<8xf32>
    %127 = vector.shape_cast %126 : vector<8xf32> to vector<8x1xf32>
    %cst_22 = arith.constant 1.600000e+01 : f32
    %128 = vector.broadcast %cst_22 : f32 to vector<8x1xf32>
    %129 = arith.divf %127, %128 : vector<8x1xf32>
    %130 = vector.broadcast %129 : vector<8x1xf32> to vector<8x16xf32>
    %131 = arith.subf %125, %130 : vector<8x16xf32>
    %132 = arith.mulf %131, %131 : vector<8x16xf32>
    %cst_23 = arith.constant dense<0.000000e+00> : vector<8xf32>
    %133 = vector.multi_reduction <add>, %132, %cst_23 [1] : vector<8x16xf32> to vector<8xf32>
    %134 = vector.shape_cast %133 : vector<8xf32> to vector<8x1xf32>
    %cst_24 = arith.constant 1.600000e+01 : f32
    %135 = vector.broadcast %cst_24 : f32 to vector<8x1xf32>
    %136 = arith.divf %134, %135 : vector<8x1xf32>
    %137 = vector.broadcast %129 : vector<8x1xf32> to vector<8x16xf32>
    %138 = arith.subf %125, %137 : vector<8x16xf32>
    %cst_25 = arith.constant 9.99999974E-6 : f32
    %139 = vector.broadcast %cst_25 : f32 to vector<8x1xf32>
    %140 = arith.addf %136, %139 : vector<8x1xf32>
    %141 = math.rsqrt %140 : vector<8x1xf32>
    %142 = vector.broadcast %141 : vector<8x1xf32> to vector<8x16xf32>
    %143 = arith.mulf %138, %142 : vector<8x16xf32>
    %144 = vector.broadcast %11 : vector<1x16xf32> to vector<8x16xf32>
    %145 = arith.mulf %143, %144 : vector<8x16xf32>
    %146 = vector.broadcast %12 : vector<1x16xf32> to vector<8x16xf32>
    %147 = arith.addf %145, %146 : vector<8x16xf32>
    %cst_26 = arith.constant 0.000000e+00 : f32
    %148 = vector.broadcast %cst_26 : f32 to vector<8x16xf32>
    %149 = arith.cmpf oge, %147, %148 : vector<8x16xf32>
    %cst_27 = arith.constant 0.00999999977 : f32
    %150 = vector.broadcast %cst_27 : f32 to vector<8x16xf32>
    %151 = arith.mulf %150, %147 : vector<8x16xf32>
    %152 = arith.select %149, %147, %151 : vector<8x16xi1>, vector<8x16xf32>
    %cst_28 = arith.constant dense<0.000000e+00> : vector<8x8xf32>
    %153 = tpu.matmul %152, %5, %cst_28 {dimension_numbers = #tpu.dot_dimension_numbers<[1], [0], [0], [1], [0, 0, 1, 1], [], []>} : vector<8x16xf32>, vector<16x8xf32>, vector<8x8xf32> -> vector<8x8xf32>
    %154 = vector.broadcast %13 : vector<1x8xf32> to vector<8x8xf32>
    %155 = arith.addf %153, %154 : vector<8x8xf32>
    %c0_29 = arith.constant 0 : index
    %c0_30 = arith.constant 0 : index
    %156 = vector.load %arg2[%c0_29, %c0_30] : memref<8x8xf32, #tpu.memory_space<vmem>>, vector<8x8xf32>
    tpu.vector_store %arg2[%c0_29, %c0_30], %155 {strides = array<i32>} : memref<8x8xf32, #tpu.memory_space<vmem>>, vector<8x8xf32>,
    return
  }
}

</mosaic_0001>

<bundles_post_ra>
// kernel: basic_rnn_forward.1
= control target key start
LH: loop header
LB: loop body
LE: loop exit
PB: predicated region body
PF: predicated region fallthrough
CT: control target
= control target key end

     0   :  { %v1470_v3 = vmov 0   ;;  %s1709_s0 = inlined_call_operand.vmem [shape: s32[8,8], index: 0, kind: input, shape index: {}]   ;;  %s1710_s1 = inlined_call_operand.vmem [shape: f32[136,32], index: 1, kind: input, shape index: {}]   ;;  %s1711_s2 = inlined_call_operand.hbm [shape: f32[8,8], index: 2, kind: output, shape index: {}]  }
   0x1   :  { %v1500_v0 = vld [vmem:[%s1709_s0] sm:$0xff]  ;;  %v13_v2 = vld [vmem:[%s1710_s1 + $0x8] sm:$0xff]  ;;  %1417 = vset.pattern.permute.xlu0 %v1470_v3 }
   0x2   :  { %v12_v1 = vld [vmem:[%s1710_s1] sm:$0xff]  ;;  %v17_v6 = vld [vmem:[%s1710_s1 + $0x28] sm:$0xff] }
   0x3   :  { %v1337_v4 = vpack.c.bf16 %v13_v2, %v12_v1  ;;  %v16_v5 = vld [vmem:[%s1710_s1 + $0x20] sm:$0xff] }
   0x4   :  { %7 = vsyncpa [#allocation3], 0  ;;  %33 = vperm.xlu0 %1417, %v1500_v0   ;;  %v14_v7 = vld [vmem:[%s1710_s1 + $0x10] sm:$0xff]  ;;  %v15_v8 = vld [vmem:[%s1710_s1 + $0x18] sm:$0xff]  ;;  %v1471_v9 = vmov 0.0|0.0   ;;  %v1522_v10 = vpack.c.bf16 %v17_v6, %v16_v5  ;;  %v1472_v14 = vmov 1   ;;  %v30_v17 = vlaneseq }
   0x5   :  { %1338 = vmatprep.subr.bf16.mxu0 %v1337_v4  ;;  %1345 = vmatprep.subr.bf16.mxu1 %v1471_v9  ;;  %v1341_v11 = vpack.c.bf16 %v15_v8, %v14_v7  ;;  %v18_v12 = vld [vmem:[%s1710_s1 + $0x30] sm:$0xff]  ;;  %v19_v13 = vld [vmem:[%s1710_s1 + $0x38] sm:$0xff]  ;;  %vm1473_vm0 = vmmov 0   ;;  %v1474_v16 = vmov 0.0   ;;  %vm84_vm1 = vcmask 261120   ;;  %v1571_v33 = vld [vmem:[%s1710_s1 + $0x80] sm:$0xff] }
   0x6   :  { %1340 = vmatpush3.bf16.msra.mxu0 %v1337_v4  ;;  %1347 = vmatpush3.bf16.msra.mxu1 %v1522_v10  ;;  %v1532_v15 = vpack.c.bf16 %v19_v13, %v18_v12  ;;  %v1547_v18 = vand.u32 127, %v30_v17  ;;  %v1475_v25 = vmov 2   ;;  %v1476_v26 = vmov 5  }
   0x7   :  { %1342 = vmatprep.subr.bf16.mxu0 %v1341_v11  ;;  %1348 = vmatprep.subr.bf16.mxu1 %v1471_v9  ;;  %v1477_v27 = vmov 3   ;;  %v1478_v28 = vmov 7   ;;  %v1479_v29 = vmov 4   ;;  %v1480_v30 = vmov 6  }
   0x8   :  { %1418 = vset.pattern.permute.xlu0 %v1472_v14  ;;  %1232 = vmatprep.mubr.msk.f32.mxu1 %vm1473_vm0, %v1474_v16  ;;  %v1565_v31 = vshrl.u32 %v30_v17, 7  ;;  %vm891_vm10 = vcmask 130048   ;;  %vm1099_vm13 = vcmask 64512  }
   0x9   :  { %39 = vperm.xlu0 %1418, %v1500_v0   ;;  %1419 = vset.pattern.permute.xlu1 %v1475_v25 }
   0xa   :  { %1344 = vmatpush3.bf16.msra.mxu0 %v1341_v11  ;;  %1350 = vmatpush3.bf16.msra.mxu1 %v1532_v15  ;;  %v82_v32 = vsub.s32 0, %v1565_v31 }
   0xb   :  { %1357 = vmatprep.subr.bf16.mxu0 %v1471_v9  ;;  %1351 = vmatprep.subr.bf16.mxu1 %v1471_v9 }
   0xc   :  { %45 = vperm.xlu1 %1419, %v1500_v0   ;;  %v1574_v34 = vrot.slane %v1571_v33, %v82_v32 }
   0xd   :  { %1233 = vmatmul.mubr.f32.vlgmr.msra.gmra.mrb[0].mxu1 %v1474_v16  ;;  %1422 = vset.pattern.permute.xlu0 %v1476_v26  ;;  %v20_v26 = vld [vmem:[%s1710_s1 + $0x40] sm:$0xff] }
   0xe   :  { %1353 = vmatpush3.bf16.msra.mxu1 %v1522_v10  ;;  %1243 = vmatprep.mubr.msk.f32.mxu1 %vm1473_vm0, %v1474_v16 }
   0xf   :  { %1354 = vmatprep.subr.bf16.mxu1 %v1471_v9  ;;  %63 = vperm.xlu0 %1422, %v1500_v0  }
  0x10   :  { %1420 = vset.pattern.permute.xlu1 %v1477_v27  ;;  %v21_v27 = vld [vmem:[%s1710_s1 + $0x48] sm:$0xff] }
  0x11   :  { %51 = vperm.xlu1 %1420, %v1500_v0  }
  0x12   :  { %1356 = vmatpush3.bf16.msra.mxu1 %v1532_v15 }
  0x13   :  { %1363 = vmatprep.subr.bf16.mxu1 %v1471_v9  ;;  %1425 = vset.pattern.permute.xlu0 %v1478_v28 }
  0x15   :  { %1421 = vset.pattern.permute.xlu1 %v1479_v29  ;;  %v1394_v29 = vpack.c.bf16 %v21_v27, %v20_v26 }
  0x16   :  { %57 = vperm.xlu1 %1421, %v1500_v0  }
  0x1a   :  { %1423 = vset.pattern.permute.xlu1 %v1480_v30  ;;  %v23_v30 = vld [vmem:[%s1710_s1 + $0x58] sm:$0xff] }
  0x1b   :  { %69 = vperm.xlu1 %1423, %v1500_v0  }
  0x1f   :  { %1424 = vset.pattern.permute.xlu1 %v1478_v28  ;;  %v22_v28 = vld [vmem:[%s1710_s1 + $0x50] sm:$0xff] }
  0x20   :  { %75 = vperm.xlu1 %1424, %v1500_v0   ;;  %v1397_v32 = vpack.c.bf16 %v23_v30, %v22_v28 }
  0x83   :  { %v34_v19 = vpop.permute.xlu0 %33 }
  0x84   :  { %vm35_vm2 = vcmp.eq.s32.totalorder %v1547_v18, %v34_v19 }
  0x85   :  { %v1115_v20 = vsel %vm35_vm2, 1.0, %v1474_v16 }
  0x86   :  { %1212 = vmatprep.mubr.msk.f32.mxu0 %vm84_vm1, %v1115_v20 }
  0x88   :  { %v40_v21 = vpop.permute.xlu0 %39 }
  0x89   :  { %vm41_vm3 = vcmp.eq.s32.totalorder %v1547_v18, %v40_v21 }
  0x8a   :  { %v1116_v22 = vsel %vm41_vm3, 1.0, %v1474_v16 }
  0x8b   :  { %1213 = vmatmul.mubr.msk.f32.vlgmr.msra.gmra.mrb[0].mxu0 %vm84_vm1, %v1116_v22  ;;  %v46_v40 = vpop.permute.xlu1 %45 }
  0x8c   :  { %1359 = vmatpush3.bf16.msra.mxu0 %v1522_v10  ;;  %vm47_vm4 = vcmp.eq.s32.totalorder %v1547_v18, %v46_v40  ;;  %v816_v40 = vsub.s32 1, %v1565_v31 }
  0x8d   :  { %1360 = vmatprep.subr.bf16.mxu0 %v1471_v9  ;;  %v1117_v41 = vsel %vm47_vm4, 1.0, %v1474_v16 }
  0x8e   :  { %1215 = vmatprep.mubr.msk.f32.mxu0 %vm84_vm1, %v1117_v41  ;;  %v64_v46 = vpop.permute.xlu0 %63  ;;  %v817_v41 = vrot.slane %v1571_v33, %v816_v40 }
  0x8f   :  { %vm65_vm7 = vcmp.eq.s32.totalorder %v1547_v18, %v64_v46 }
  0x90   :  { %1362 = vmatpush3.bf16.msra.mxu0 %v1532_v15  ;;  %v52_v42 = vpop.permute.xlu1 %51  ;;  %v1120_v48 = vsel %vm65_vm7, 1.0, %v1474_v16 }
  0x91   :  { %1369 = vmatprep.subr.bf16.mxu0 %v1471_v9  ;;  %vm53_vm5 = vcmp.eq.s32.totalorder %v1547_v18, %v52_v42 }
  0x92   :  { %v1118_v43 = vsel %vm53_vm5, 1.0, %v1474_v16 }
  0x93   :  { %1216 = vmatmul.mubr.msk.f32.gmra.mrb[2].mxu0 %vm84_vm1, %v1118_v43 }
  0x95   :  { %v58_v44 = vpop.permute.xlu1 %57 }
  0x96   :  { %vm59_vm6 = vcmp.eq.s32.totalorder %v1547_v18, %v58_v44 }
  0x97   :  { %v1119_v45 = vsel %vm59_vm6, 1.0, %v1474_v16 }
  0x98   :  { %1218 = vmatprep.mubr.msk.f32.mxu0 %vm84_vm1, %v1119_v45 }
  0x99   :  { %1219 = vmatmul.mubr.msk.f32.gmra.mrb[4].mxu0 %vm84_vm1, %v1120_v48 }
  0x9a   :  { %v70_v47 = vpop.permute.xlu1 %69 }
  0x9b   :  { %vm71_vm8 = vcmp.eq.s32.totalorder %v1547_v18, %v70_v47 }
  0x9c   :  { %v1121_v49 = vsel %vm71_vm8, 1.0, %v1474_v16 }
  0x9d   :  { %1221 = vmatprep.mubr.msk.f32.mxu0 %vm84_vm1, %v1121_v49 }
  0x9f   :  { %v76_v50 = vpop.permute.xlu1 %75 }
  0xa0   :  { %vm77_vm9 = vcmp.eq.s32.totalorder %v1547_v18, %v76_v50  ;;  %v24_v50 = vld [vmem:[%s1710_s1 + $0x60] sm:$0xff] }
  0xa1   :  { %v1122_v51 = vsel %vm77_vm9, 1.0, %v1474_v16 }
  0xa2   :  { %1222 = vmatmul.mubr.msk.f32.gmra.mrb[6].mxu0 %vm84_vm1, %v1122_v51  ;;  %v25_v51 = vld [vmem:[%s1710_s1 + $0x68] sm:$0xff] }
  0xa3   :  { %1254 = vmatprep.mubr.msk.f32.mxu0 %vm1473_vm0, %v1474_v16 }
  0xe0   :  { %v283_v23 = vpop.f32.mrb[0].mxu1 }
  0xe1   :  { %v1234_v24 = vpop.f32.mrb[1].mxu1 }
 0x15e   :  { %v1214_v35 = vpop.f32.mrb[0].mxu0 }
 0x15f   :  { %v175_v36 = vpop.f32.mrb[1].mxu0  ;;  %v181_v52 = vadd.f32 %v1214_v35, %v1574_v34 }
 0x160   :  { %v176_v37 = vadd.f32 %v175_v36, %v1574_v34 }
 0x162   :  { %v287_v38 = vadd.f32 %v283_v23, %v176_v37 }
 0x164   :  { %1426 = vtanh.f32 %v287_v38 }
 0x166   :  { %v1217_v56 = vpop.f32.mrb[2].mxu0 }
 0x167   :  { %v185_v57 = vpop.f32.mrb[3].mxu0  ;;  %v191_v4 = vadd.f32 %v1217_v56, %v1574_v34  ;;  %v908_v56 = vsub.s32 2, %v1565_v31 }
 0x168   :  { %v186_v63 = vadd.f32 %v185_v57, %v1574_v34  ;;  %v913_v57 = vsub.s32 3, %v1565_v31 }
 0x16c   :  { %v1220_v59 = vpop.f32.mrb[4].mxu0 }
 0x16d   :  { %v195_v60 = vpop.f32.mrb[5].mxu0  ;;  %v201_v18 = vadd.f32 %v1220_v59, %v1574_v34 }
 0x16e   :  { %v1427_v39 = vpop.eup %1426  ;;  %v196_v11 = vadd.f32 %v195_v60, %v1574_v34 }
 0x16f   :  { %1244 = vmatmul.mubr.msk.f32.vlgmr.msra.gmra.mrb[2].mxu1 %vm84_vm1, %v1427_v39 }
 0x170   :  { %1365 = vmatpush3.bf16.msra.mxu1 %v1522_v10  ;;  %1265 = vmatprep.mubr.msk.f32.mxu1 %vm1473_vm0, %v1474_v16 }
 0x171   :  { %1366 = vmatprep.subr.bf16.mxu1 %v1471_v9 }
 0x174   :  { %1368 = vmatpush3.bf16.msra.mxu1 %v1532_v15 }
 0x175   :  { %1375 = vmatprep.subr.bf16.mxu1 %v1471_v9  ;;  %v1612_v61 = vpop.f32.mrb[6].mxu0 }
 0x176   :  { %v205_v62 = vpop.f32.mrb[7].mxu0  ;;  %v211_v35 = vadd.f32 %v1612_v61, %v1574_v34  ;;  %v914_v61 = vrot.slane %v1571_v33, %v913_v57 }
 0x242   :  { %v358_v53 = vpop.f32.mrb[2].mxu1 }
 0x243   :  { %v362_v54 = vadd.f32 %v358_v53, %v181_v52  ;;  %v1245_v55 = vpop.f32.mrb[3].mxu1  ;;  %v1400_v52 = vpack.c.bf16 %v25_v51, %v24_v50 }
 0x245   :  { %1428 = vtanh.f32 %v362_v54 }
 0x24f   :  { %v1429_v58 = vpop.eup %1428 }
 0x250   :  { %1255 = vmatmul.mubr.msk.f32.vlgmr.msra.gmra.mrb[8].mxu0 %vm84_vm1, %v1429_v58  ;;  %v909_v58 = vrot.slane %v1571_v33, %v908_v56 }
 0x251   :  { %1371 = vmatpush3.bf16.msra.mxu0 %v1522_v10  ;;  %1276 = vmatprep.mubr.msk.f32.mxu0 %vm1473_vm0, %v1474_v16 }
 0x252   :  { %1372 = vmatprep.subr.bf16.mxu0 %v1471_v9 }
 0x255   :  { %1374 = vmatpush3.bf16.msra.mxu0 %v1532_v15 }
 0x256   :  { %1381 = vmatprep.subr.bf16.mxu0 %v1471_v9 }
 0x323   :  { %v433_v0 = vpop.f32.mrb[8].mxu0 }
 0x324   :  { %v437_v1 = vadd.f32 %v433_v0, %v186_v63  ;;  %v1256_v2 = vpop.f32.mrb[9].mxu0 }
 0x326   :  { %1430 = vtanh.f32 %v437_v1 }
 0x330   :  { %v1431_v3 = vpop.eup %1430 }
 0x331   :  { %1266 = vmatmul.mubr.msk.f32.vlgmr.msra.gmra.mrb[4].mxu1 %vm84_vm1, %v1431_v3 }
 0x332   :  { %1377 = vmatpush3.bf16.msra.mxu1 %v1522_v10  ;;  %1287 = vmatprep.mubr.msk.f32.mxu1 %vm1473_vm0, %v1474_v16 }
 0x333   :  { %1378 = vmatprep.subr.bf16.mxu1 %v1471_v9 }
 0x336   :  { %1380 = vmatpush3.bf16.msra.mxu1 %v1532_v15 }
 0x337   :  { %1387 = vmatprep.subr.bf16.mxu1 %v1471_v9 }
 0x404   :  { %v508_v5 = vpop.f32.mrb[4].mxu1 }
 0x405   :  { %v512_v6 = vadd.f32 %v508_v5, %v191_v4  ;;  %v1267_v7 = vpop.f32.mrb[5].mxu1 }
 0x407   :  { %1432 = vtanh.f32 %v512_v6 }
 0x411   :  { %v1433_v8 = vpop.eup %1432 }
 0x412   :  { %1277 = vmatmul.mubr.msk.f32.vlgmr.msra.gmra.mrb[10].mxu0 %vm84_vm1, %v1433_v8 }
 0x413   :  { %1383 = vmatpush3.bf16.msra.mxu0 %v1522_v10  ;;  %1298 = vmatprep.mubr.msk.f32.mxu0 %vm1473_vm0, %v1474_v16 }
 0x414   :  { %1384 = vmatprep.subr.bf16.mxu0 %v1471_v9 }
 0x417   :  { %1386 = vmatpush3.bf16.msra.mxu0 %v1532_v15 }
 0x418   :  { %1393 = vmatprep.subr.bf16.mxu0 %v1471_v9 }
 0x4e5   :  { %v583_v12 = vpop.f32.mrb[10].mxu0 }
 0x4e6   :  { %v587_v13 = vadd.f32 %v583_v12, %v196_v11  ;;  %v1278_v14 = vpop.f32.mrb[11].mxu0 }
 0x4e7   :  { %v27_v14 = vld [vmem:[%s1710_s1 + $0x78] sm:$0xff] }
 0x4e8   :  { %1434 = vtanh.f32 %v587_v13 }
 0x4f2   :  { %v1435_v17 = vpop.eup %1434 }
 0x4f3   :  { %1288 = vmatmul.mubr.msk.f32.vlgmr.msra.gmra.mrb[6].mxu1 %vm84_vm1, %v1435_v17 }
 0x4f4   :  { %1389 = vmatpush3.bf16.msra.mxu1 %v1522_v10  ;;  %1309 = vmatprep.mubr.msk.f32.mxu1 %vm1473_vm0, %v1474_v16  ;;  %v206_v10 = vadd.f32 %v205_v62, %v1574_v34 }
 0x4f5   :  { %1390 = vmatprep.subr.bf16.mxu1 %v1471_v9 }
 0x4f8   :  { %1392 = vmatpush3.bf16.msra.mxu1 %v1532_v15 }
 0x4f9   :  { %1399 = vmatprep.subr.bf16.mxu1 %v1471_v9 }
 0x5c6   :  { %v658_v19 = vpop.f32.mrb[6].mxu1 }
 0x5c7   :  { %v662_v20 = vadd.f32 %v658_v19, %v201_v18  ;;  %v1289_v21 = vpop.f32.mrb[7].mxu1 }
 0x5c8   :  { %v1011_v21 = vsub.s32 5, %v1565_v31 }
 0x5c9   :  { %1436 = vtanh.f32 %v662_v20 }
 0x5d3   :  { %v1437_v22 = vpop.eup %1436 }
 0x5d4   :  { %1299 = vmatmul.mubr.msk.f32.vlgmr.msra.gmra.mrb[12].mxu0 %vm84_vm1, %v1437_v22  ;;  %v1016_v22 = vsub.s32 6, %v1565_v31 }
 0x5d5   :  { %1320 = vmatprep.mubr.msk.f32.mxu0 %vm1473_vm0, %v1474_v16  ;;  %1395 = vmatpush3.bf16.msra.mxu0 %v1394_v29  ;;  %v1024_v29 = vsub.s32 7, %v1565_v31 }
 0x5d6   :  { %1396 = vmatprep.subr.bf16.mxu0 %v1471_v9 }
 0x5d7   :  { %v1025_v30 = vrot.slane %v1571_v33, %v1024_v29 }
 0x5d9   :  { %1398 = vmatpush3.bf16.msra.mxu0 %v1397_v32 }
 0x6a7   :  { %v733_v23 = vpop.f32.mrb[12].mxu0 }
 0x6a8   :  { %v737_v24 = vadd.f32 %v733_v23, %v206_v10  ;;  %v1300_v25 = vpop.f32.mrb[13].mxu0  ;;  %v1012_v10 = vrot.slane %v1571_v33, %v1011_v21 }
 0x6a9   :  { %v1017_v25 = vrot.slane %v1571_v33, %v1016_v22 }
 0x6aa   :  { %1438 = vtanh.f32 %v737_v24 }
 0x6b4   :  { %v1439_v15 = vpop.eup %1438 }
 0x6b5   :  { %1310 = vmatmul.mubr.msk.f32.vlgmr.msra.gmra.mrb[8].mxu1 %vm84_vm1, %v1439_v15 }
 0x6b6   :  { %1327 = vmatprep.mubr.msk.f32.mxu1 %vm1473_vm0, %v1474_v16  ;;  %1401 = vmatpush3.bf16.msra.mxu1 %v1400_v52 }
 0x6b7   :  { %1402 = vmatprep.subr.bf16.mxu1 %v1471_v9  ;;  %v921_v9 = vsub.s32 4, %v1565_v31 }
 0x6b9   :  { %v922_v2 = vrot.slane %v1571_v33, %v921_v9 }
 0x788   :  { %v808_v36 = vpop.f32.mrb[8].mxu1 }
 0x789   :  { %v812_v37 = vadd.f32 %v808_v36, %v211_v35  ;;  %v1311_v38 = vpop.f32.mrb[9].mxu1 }
 0x78b   :  { %1440 = vtanh.f32 %v812_v37 }
 0x795   :  { %v1441_v39 = vpop.eup %1440 }
 0x796   :  { %1321 = vmatmul.mubr.msk.f32.vlgmr.msra.gmra.mrb[14].mxu0 %vm84_vm1, %v1441_v39 }
 0x869   :  { %v887_v42 = vpop.f32.mrb[14].mxu0 }
 0x86a   :  { %v888_v43 = vadd.f32 %v887_v42, %v817_v41  ;;  %v1322_v44 = vpop.f32.mrb[15].mxu0 }
 0x86c   :  { %v892_v45 = vsel %vm891_vm10, %v888_v43, 0.0 }
 0x86d   :  { %893 = vadd.xlane.f32.xlu0 %v892_v45 }
 0x8fa   :  { %v894_v46 = vpop.xlane.xlu0 %893 }
 0x8fb   :  { %v896_v34 = vmul.f32 0.0625, %v894_v46 }
 0x8fd   :  { %v897_v47 = vsub.f32 %v888_v43, %v896_v34 }
 0x8ff   :  { %v898_v48 = vmul.f32 %v897_v47, %v897_v47 }
 0x901   :  { %v899_v49 = vsel %vm891_vm10, %v898_v48, 0.0 }
 0x902   :  { %900 = vadd.xlane.f32.xlu1 %v899_v49 }
 0x98f   :  { %v901_v53 = vpop.xlane.xlu1 %900 }
 0x990   :  { %v902_v54 = vmul.f32 0.0625, %v901_v53 }
 0x992   :  { %v903_v55 = vadd.f32 1e-05, %v902_v54 }
 0x994   :  { %1442 = vrsqrt.f32 %v903_v55 }
 0x99e   :  { %v1443_v59 = vpop.eup %1442 }
 0x99f   :  { %v905_v60 = vmul.f32 %v1443_v59, %v897_v47 }
 0x9a1   :  { %v910_v62 = vmul.f32 %v909_v58, %v905_v60 }
 0x9a3   :  { %v915_v63 = vadd.f32 %v914_v61, %v910_v62 }
 0x9a5   :  { %vm916_vm11 = vcmp.ge.f32.partialorder %v915_v63, 0.0  ;;  %v917_v0 = vmul.f32 0.01, %v915_v63 }
 0x9a7   :  { %v918_v1 = vsel %vm916_vm11, %v915_v63, %v917_v0 }
 0x9a8   :  { %1328 = vmatmul.mubr.msk.f32.vlgmr.msra.gmra.mrb[10].mxu1 %vm891_vm10, %v918_v1 }
 0x9a9   :  { %1334 = vmatprep.mubr.msk.f32.mxu1 %vm1473_vm0, %v1474_v16  ;;  %v26_v16 = vld [vmem:[%s1710_s1 + $0x70] sm:$0xff]  ;;  %s1481_s1 = smov [#allocation2]  }
 0x9aa   :  { %v1403_v17 = vpack.c.bf16 %v27_v14, %v26_v16  ;;  %s1107_s16 = sshll.u32 %s1481_s1, 4  ;;  %s1108_s16 = int_to_ptr.vmem [resolvable:$true] %s1107_s16 }
 0x9ab   :  { %s1446_s17 = scalar_lea.vmem %s1108_s16, 128  ;;  %p1451_p1 = scmp.lt.s32.totalorder %s1108_s16, %s1108_s16 }
 0x9ac   :  { %1404 = vmatpush3.bf16.msra.mxu1 %v1403_v17  ;;  %p1447_p0 = scmp.ne.s32.totalorder %s1108_s16, %s1446_s17  ;;  %p1452_p2 = scmp.lt.s32.totalorder %s1446_s17, %s1446_s17 }
 0x9ae   :  { %p1453_p3 = por %p1452_p2, %p1451_p1 }
 0x9b0   :  { %p1454_p4 = pnand %p1453_p3, %p1447_p0 }
 0xa7b   :  { %v992_v3 = vpop.f32.mrb[10].mxu1 }
 0xa7c   :  { %v993_v4 = vadd.f32 %v992_v3, %v922_v2  ;;  %v1329_v5 = vpop.f32.mrb[11].mxu1 }
 0xa7e   :  { %v996_v6 = vsel %vm891_vm10, %v993_v4, 0.0 }
 0xa7f   :  { %997 = vadd.xlane.f32.xlu0 %v996_v6 }
 0xb0c   :  { %v998_v7 = vpop.xlane.xlu0 %997 }
 0xb0d   :  { %v999_v8 = vmul.f32 0.0625, %v998_v7 }
 0xb0f   :  { %v1000_v11 = vsub.f32 %v993_v4, %v999_v8 }
 0xb11   :  { %v1001_v12 = vmul.f32 %v1000_v11, %v1000_v11 }
 0xb13   :  { %v1002_v13 = vsel %vm891_vm10, %v1001_v12, 0.0 }
 0xb14   :  { %1003 = vadd.xlane.f32.xlu0 %v1002_v13 }
 0xba1   :  { %v1004_v18 = vpop.xlane.xlu0 %1003 }
 0xba2   :  { %v1005_v19 = vmul.f32 0.0625, %v1004_v18 }
 0xba4   :  { %v1006_v20 = vadd.f32 1e-05, %v1005_v19 }
 0xba6   :  { %1444 = vrsqrt.f32 %v1006_v20 }
 0xbb0   :  { %v1445_v23 = vpop.eup %1444 }
 0xbb1   :  { %v1008_v24 = vmul.f32 %v1445_v23, %v1000_v11 }
 0xbb3   :  { %v1013_v15 = vmul.f32 %v1012_v10, %v1008_v24 }
 0xbb5   :  { %v1018_v26 = vadd.f32 %v1017_v25, %v1013_v15 }
 0xbb7   :  { %vm1019_vm12 = vcmp.ge.f32.partialorder %v1018_v26, 0.0  ;;  %v1020_v27 = vmul.f32 0.01, %v1018_v26 }
 0xbb9   :  { %v1021_v28 = vsel %vm1019_vm12, %v1018_v26, %v1020_v27 }
 0xbba   :  { %1335 = vmatmul.mubr.msk.f32.vlgmr.msra.gmra.mrb[12].mxu1 %vm891_vm10, %v1021_v28 }
 0xc8d   :  { %v1095_v32 = vpop.f32.mrb[12].mxu1 }
 0xc8e   :  { %v1096_v35 = vadd.f32 %v1095_v32, %v1025_v30  ;;  %v1336_v36 = vpop.f32.mrb[13].mxu1 }
 0xc90   :  { %1100 = vst.msk [vmem:[#allocation2] sm:$0xff] %vm1099_vm13, %v1096_v35 }
 0xc91   :  { %1457 = shalt.err (!%p1454_p4)
}
 0xc92   :  { %s1458_s19 = scalar_lea.hbm %s1711_s2, 128 }
 0xc93   :  { %p1459_p5 = scmp.ne.s32.totalorder %s1711_s2, %s1458_s19  ;;  %p1462_p6 = scmp.lt.u32.totalorder %s1458_s19, %s1711_s2 }
 0xc95   :  { %p1464_p7 = pnand %p1462_p6, %p1459_p5 }
 0xc97   :  { %1467 = shalt.err (!%p1464_p7)
}
 0xc98   :  { %1110 = dma.vmem_to_hbm [thread:$0]  %s1108_s16, 128, %s1711_s2, [#allocation3]  }
 0xc99   :  { %1468 = dma.done.wait [#allocation3], 128  }
 0xc9a   :  { %1469 = vsyncadd [#allocation3], 4294967168 }
 0xc9b   :  { %1114 = vsyncpa [#allocation3], 1 }

</bundles_post_ra>
